<compile_context>
chip_gen: v7x
topology: tpu7x:2x2x1
jax: 0.10.0
libtpu: 0.0.40
codegen_flags: <defaults>
</compile_context>

<pallas_src>
import functools
import math

import jax
import jax.numpy as jnp
from jax import lax
from jax.experimental import pallas as pl
from jax.experimental.pallas import tpu as pltpu

LANE = 128                     # lane width (last dim of every slab)
SUB = 8                        # sublanes; per-core output slab is (SUB, LANE)
SLAB = SUB * LANE              # main/tail split granularity -> rows % 8 == 0
SQ_BLOCK_ROWS = 2048           # 1 MiB f32 per input tile per grid step
LOG_BLOCK_ROWS = 4096          # 2 MiB f32 per input tile per grid step
VMEM_LIMIT_BYTES = 32 * 1024 * 1024


# ----------------------------------------------------------------------------
# Device / tiling helpers
# ----------------------------------------------------------------------------
@functools.lru_cache(maxsize=None)
def _num_core_split():
    """2 on dual-TensorCore chips (v4 / v5p / v7x), 1 on v5e / v6e."""
    try:
        kind = jax.devices()[0].device_kind.lower()
    except Exception:
        return 1
    if ("v7" in kind) or ("v4" in kind) or ("v5p" in kind) or ("v5 p" in kind):
        return 2
    return 1


def _split_lane_major(flat):
    """View a 1-D array as a (rows,128) slab (rows % 8 == 0) + a <1024 tail.

    The reshape of the contiguous prefix is copy-free for row-major layouts;
    for sizes that are exact multiples of 1024 no slice is emitted at all
    (the test shapes below are exact multiples).
    """
    n = flat.shape[0]
    n_main = (n // SLAB) * SLAB
    main = flat[:n_main].reshape(n_main // LANE, LANE)
    tail = flat[n_main:]
    return main, tail


def _tiling(rows, target_rows):
    """Block rows, total blocks, per-core blocks, core split, edge flags."""
    block_rows = min(target_rows, rows)        # both are multiples of 8
    g = pl.cdiv(rows, block_rows)              # total row blocks
    split = max(1, min(_num_core_split(), g))  # never more cores than blocks
    gh = pl.cdiv(g, split)                     # row blocks per core
    has_partial = (rows % block_rows) != 0     # last real block is ragged
    has_overflow = (split * gh) != g           # core 1 has one extra (skipped)
    return block_rows, g, gh, split, has_partial, has_overflow


def _fold_to_slab(v, block_rows):
    """(block_rows, LANE) -> (SUB, LANE) partial sums (pure VPU adds)."""
    return v.reshape(block_rows // SUB, SUB, LANE).sum(axis=0)


# ----------------------------------------------------------------------------
# Kernel 1: partial sums of (x_hat - t)^2 and (clip(x_hat,0,1) - t)^2
# ----------------------------------------------------------------------------
def _sq_diff_kernel(rows, block_rows, gh, g, has_partial, has_overflow,
                    x_ref, t_ref, sq_out_ref, sqc_out_ref):
    i = pl.program_id(1)

    @pl.when(i == 0)
    def _():
        sq_out_ref[...] = jnp.zeros_like(sq_out_ref)
        sqc_out_ref[...] = jnp.zeros_like(sqc_out_ref)

    # Inputs are DMA'd in their native dtype; cast in-kernel.
    x = x_ref[...].astype(jnp.float32)
    t = t_ref[...].astype(jnp.float32)
    d = x - t
    dc = jnp.clip(x, 0.0, 1.0) - t
    sq = d * d
    sqc = dc * dc

    if not (has_partial or has_overflow):
        # Steady state: no masks at all.
        sq_out_ref[...] += _fold_to_slab(sq, block_rows)
        sqc_out_ref[...] += _fold_to_slab(sqc, block_rows)
    else:
        c = pl.program_id(0)
        blk = c * gh + i                          # un-clamped logical block
        steady_limit = (g - 1) if has_partial else g

        @pl.when(blk < steady_limit)
        def _():
            sq_out_ref[...] += _fold_to_slab(sq, block_rows)
            sqc_out_ref[...] += _fold_to_slab(sqc, block_rows)

        @pl.when(blk >= steady_limit)
        def _():
            # Ragged last block and/or overflow block (valid_rows <= 0).
            valid_rows = rows - blk * block_rows
            row_idx = lax.broadcasted_iota(jnp.int32, (block_rows, LANE), 0)
            m = row_idx < valid_rows
            sq_out_ref[...] += _fold_to_slab(jnp.where(m, sq, 0.0), block_rows)
            sqc_out_ref[...] += _fold_to_slab(jnp.where(m, sqc, 0.0), block_rows)


def _partial_sq_sums(x2, t2):
    rows = x2.shape[0]
    block_rows, g, gh, split, has_partial, has_overflow = _tiling(
        rows, SQ_BLOCK_ROWS)

    if has_overflow:
        in_map = lambda c, i: (jnp.minimum(c * gh + i, g - 1), 0)
    else:
        in_map = lambda c, i: (c * gh + i, 0)
    out_map = lambda c, i: (c, 0)

    kernel = functools.partial(_sq_diff_kernel, rows, block_rows, gh, g,
                               has_partial, has_overflow)
    n = rows * LANE
    cost = pl.CostEstimate(
        flops=8 * n, transcendentals=0,
        bytes_accessed=int(x2.size * x2.dtype.itemsize
                           + t2.size * t2.dtype.itemsize))

    sq_out, sqc_out = pl.pallas_call(
        kernel,
        out_shape=(
            jax.ShapeDtypeStruct((split * SUB, LANE), jnp.float32),
            jax.ShapeDtypeStruct((split * SUB, LANE), jnp.float32),
        ),
        grid=(split, gh),
        in_specs=[
            pl.BlockSpec((block_rows, LANE), in_map),
            pl.BlockSpec((block_rows, LANE), in_map),
        ],
        out_specs=(
            pl.BlockSpec((SUB, LANE), out_map),
            pl.BlockSpec((SUB, LANE), out_map),
        ),
        compiler_params=pltpu.CompilerParams(
            dimension_semantics=("parallel", "arbitrary"),
            vmem_limit_bytes=VMEM_LIMIT_BYTES),
        cost_estimate=cost,
    )(x2, t2)

    return jnp.sum(sq_out), jnp.sum(sqc_out)


def _sum_sq_diffs(x_hat, target):
    x_main, x_tail = _split_lane_major(x_hat.reshape(-1))
    t_main, t_tail = _split_lane_major(target.reshape(-1))
    s_sq = jnp.float32(0.0)
    s_sqc = jnp.float32(0.0)
    if x_main.shape[0] > 0:
        a, b = _partial_sq_sums(x_main, t_main)
        s_sq = s_sq + a
        s_sqc = s_sqc + b
    if x_tail.shape[0] > 0:      # < 1024 elements: cheap JAX glue, no padding
        xt = x_tail.astype(jnp.float32)
        tt = t_tail.astype(jnp.float32)
        d = xt - tt
        dc = jnp.clip(xt, 0.0, 1.0) - tt
        s_sq = s_sq + jnp.sum(d * d)
        s_sqc = s_sqc + jnp.sum(dc * dc)
    return s_sq, s_sqc


# ----------------------------------------------------------------------------
# Kernel 2: partial sum of log(likelihoods) (one launch per tensor, no concat)
# ----------------------------------------------------------------------------
def _log_sum_kernel(rows, block_rows, gh, g, has_partial, has_overflow,
                    lik_ref, out_ref):
    i = pl.program_id(1)

    @pl.when(i == 0)
    def _():
        out_ref[...] = jnp.zeros_like(out_ref)

    x = lik_ref[...].astype(jnp.float32)

    if not (has_partial or has_overflow):
        out_ref[...] += _fold_to_slab(jnp.log(x), block_rows)
    else:
        c = pl.program_id(0)
        blk = c * gh + i
        steady_limit = (g - 1) if has_partial else g

        @pl.when(blk < steady_limit)
        def _():
            out_ref[...] += _fold_to_slab(jnp.log(x), block_rows)

        @pl.when(blk >= steady_limit)
        def _():
            valid_rows = rows - blk * block_rows
            row_idx = lax.broadcasted_iota(jnp.int32, (block_rows, LANE), 0)
            # Neutralise garbage rows BEFORE the log (log(1) == 0).
            xm = jnp.where(row_idx < valid_rows, x, 1.0)
            out_ref[...] += _fold_to_slab(jnp.log(xm), block_rows)


def _partial_log_sum(l2):
    rows = l2.shape[0]
    block_rows, g, gh, split, has_partial, has_overflow = _tiling(
        rows, LOG_BLOCK_ROWS)

    if has_overflow:
        in_map = lambda c, i: (jnp.minimum(c * gh + i, g - 1), 0)
    else:
        in_map = lambda c, i: (c * gh + i, 0)

    kernel = functools.partial(_log_sum_kernel, rows, block_rows, gh, g,
                               has_partial, has_overflow)
    n = rows * LANE
    cost = pl.CostEstimate(flops=2 * n, transcendentals=n,
                           bytes_accessed=int(l2.size * l2.dtype.itemsize))

    out = pl.pallas_call(
        kernel,
        out_shape=jax.ShapeDtypeStruct((split * SUB, LANE), jnp.float32),
        grid=(split, gh),
        in_specs=[pl.BlockSpec((block_rows, LANE), in_map)],
        out_specs=pl.BlockSpec((SUB, LANE), lambda c, i: (c, 0)),
        compiler_params=pltpu.CompilerParams(
            dimension_semantics=("parallel", "arbitrary"),
            vmem_limit_bytes=VMEM_LIMIT_BYTES),
        cost_estimate=cost,
    )(l2)
    return jnp.sum(out)


def _sum_log_all(likelihood_list):
    """Sum of log(likelihoods) over all tensors; one kernel launch per tensor."""
    total = jnp.float32(0.0)
    for lik in likelihood_list:
        main, tail = _split_lane_major(lik.reshape(-1))
        if main.shape[0] > 0:
            total = total + _partial_log_sum(main)
        if tail.shape[0] > 0:    # < 1024 elements: cheap JAX glue
            total = total + jnp.sum(jnp.log(tail.astype(jnp.float32)))
    return total


# ----------------------------------------------------------------------------
# RateDistortionLoss.forward equivalent
# ----------------------------------------------------------------------------
def rate_distortion_loss(output, target, lmbda=0.01):
    """output: dict with 'x_hat' (N,C,H,W) and 'likelihoods' (dict of arrays)."""
    N, _, H, W = target.shape
    num_pixels = N * H * W
    n_elems = float(target.size)   # nn.MSELoss averages over ALL elements

    # bpp_loss = sum_k sum(log(likelihoods_k)) / (-log(2) * num_pixels)
    log_sum = _sum_log_all(list(output["likelihoods"].values()))
    bpp_loss = log_sum / (-math.log(2) * num_pixels)

    # mse over x_hat, and mse over clamp(x_hat, 0, 1) for PSNR
    sum_sq, sum_sq_clamped = _sum_sq_diffs(output["x_hat"], target)
    mse_loss = sum_sq / n_elems
    mse_clamped = sum_sq_clamped / n_elems

    rdloss = lmbda * (255.0 ** 2) * mse_loss + bpp_loss

    # psnr with the mse == 0 edge case returning 100 (safe denominator so the
    # discarded branch never produces inf/nan, incl. under autodiff).
    safe_mse = jnp.where(mse_clamped == 0.0, jnp.float32(1.0), mse_clamped)
    psnr = jnp.where(mse_clamped == 0.0, jnp.float32(100.0),
                     10.0 * jnp.log10(1.0 / safe_mse))

    return {
        "bpp_loss": bpp_loss,
        "mse_loss": mse_loss,
        "rdloss": rdloss,
        "psnr": psnr,
    }


if __name__ == "__main__":
    key = jax.random.PRNGKey(0)
    k1, k2, k3, k4 = jax.random.split(key, 4)

    N, C, H, W = 2, 3, 32, 32
    target = jax.random.uniform(k1, (N, C, H, W), dtype=jnp.float32)
    x_hat = target + 0.05 * jax.random.normal(k2, (N, C, H, W), dtype=jnp.float32)
    # synthetic likelihood tensors (values in (0, 1], like entropy-model outputs)
    lik_y = jax.random.uniform(k3, (N, 16, H // 4, W // 4),
                               dtype=jnp.float32, minval=0.01, maxval=1.0)
    lik_z = jax.random.uniform(k4, (N, 16, H // 8, W // 8),
                               dtype=jnp.float32, minval=0.01, maxval=1.0)

    out = rate_distortion_loss(
        {"x_hat": x_hat, "likelihoods": {"y": lik_y, "z": lik_z}},
        target,
        lmbda=0.01,
    )
    out = jax.block_until_ready(out)

    # Lightweight pure-JAX reference check (same forward semantics).
    num_pixels = N * H * W
    ref_bpp = (jnp.sum(jnp.log(lik_y)) + jnp.sum(jnp.log(lik_z))) / (
        -math.log(2) * num_pixels)
    ref_mse = jnp.mean((x_hat - target) ** 2)
    ref_rd = 0.01 * (255.0 ** 2) * ref_mse + ref_bpp
    ref_mse_c = jnp.mean((jnp.clip(x_hat, 0.0, 1.0) - target) ** 2)
    ref_psnr = 10.0 * jnp.log10(1.0 / ref_mse_c)
    assert jnp.allclose(out["bpp_loss"], ref_bpp, rtol=1e-4, atol=1e-6)
    assert jnp.allclose(out["mse_loss"], ref_mse, rtol=1e-4, atol=1e-7)
    assert jnp.allclose(out["rdloss"], ref_rd, rtol=1e-4, atol=1e-6)
    assert jnp.allclose(out["psnr"], ref_psnr, rtol=1e-4, atol=1e-4)

    print("KERNEL_OK")
</pallas_src>

<mosaic_0001>
module attributes {stable_mosaic.version = 11 : i64} {
  func.func @_log_sum_kernel(%arg0: i32, %arg1: i32, %arg2: memref<16x128xf32, #tpu.memory_space<vmem>>, %arg3: memref<8x128xf32, #tpu.memory_space<vmem>>) attributes {dimension_semantics = [#tpu.dimension_semantics<parallel>, #tpu.dimension_semantics<arbitrary>], iteration_bounds = array<i64: 1, 1>, scalar_prefetch = 0 : i64, scratch_operands = 0 : i64, tpu.core_type = #tpu.core_type<tc>, window_params = [{transform_indices = @transform_0, window_bounds = array<i64: 16, 128>}, {transform_indices = @transform_1, window_bounds = array<i64: 8, 128>}]} {
    %c0_i32 = arith.constant 0 : i32
    %0 = arith.cmpi eq, %arg1, %c0_i32 : i32
    %1 = arith.extui %0 : i1 to i32
    %c0_i32_0 = arith.constant 0 : i32
    %2 = arith.cmpi ne, %1, %c0_i32_0 : i32
    scf.if %2 {
      %cst_6 = arith.constant 0.000000e+00 : f32
      %10 = vector.broadcast %cst_6 : f32 to vector<8x128xf32>
      %c0_7 = arith.constant 0 : index
      %c0_8 = arith.constant 0 : index
      %11 = vector.load %arg3[%c0_7, %c0_8] : memref<8x128xf32, #tpu.memory_space<vmem>>, vector<8x128xf32>
      tpu.vector_store %arg3[%c0_7, %c0_8], %10 {strides = array<i32>} : memref<8x128xf32, #tpu.memory_space<vmem>>, vector<8x128xf32>,
    } else {
    }
    %c0 = arith.constant 0 : index
    %c0_1 = arith.constant 0 : index
    %3 = vector.load %arg2[%c0, %c0_1] : memref<16x128xf32, #tpu.memory_space<vmem>>, vector<16x128xf32>
    %c0_2 = arith.constant 0 : index
    %c0_3 = arith.constant 0 : index
    %4 = vector.load %arg3[%c0_2, %c0_3] : memref<8x128xf32, #tpu.memory_space<vmem>>, vector<8x128xf32>
    %5 = math.log %3 : vector<16x128xf32>
    %6 = vector.shape_cast %5 : vector<16x128xf32> to vector<2x8x128xf32>
    %cst = arith.constant dense<0.000000e+00> : vector<8x128xf32>
    %7 = vector.multi_reduction <add>, %6, %cst [0] : vector<2x8x128xf32> to vector<8x128xf32>
    %8 = arith.addf %4, %7 : vector<8x128xf32>
    %c0_4 = arith.constant 0 : index
    %c0_5 = arith.constant 0 : index
    %9 = vector.load %arg3[%c0_4, %c0_5] : memref<8x128xf32, #tpu.memory_space<vmem>>, vector<8x128xf32>
    tpu.vector_store %arg3[%c0_4, %c0_5], %8 {strides = array<i32>} : memref<8x128xf32, #tpu.memory_space<vmem>>, vector<8x128xf32>,
    return
  }
  func.func @transform_0(%arg0: i32, %arg1: i32) -> (i32, i32) {
    %c1_i32 = arith.constant 1 : i32
    %0 = arith.muli %arg0, %c1_i32 : i32
    %1 = arith.addi %0, %arg1 : i32
    %c0_i32 = arith.constant 0 : i32
    %c0_i32_0 = arith.constant 0 : i32
    return %1, %c0_i32 : i32, i32
  }
  func.func @transform_1(%arg0: i32, %arg1: i32) -> (i32, i32) {
    %c0_i32 = arith.constant 0 : i32
    %c0_i32_0 = arith.constant 0 : i32
    return %arg0, %c0_i32 : i32, i32
  }
}

</mosaic_0001>

<bundles_post_ra>
// kernel: tpu_custom_call.1
= control target key start
LH: loop header
LB: loop body
LE: loop exit
PB: predicated region body
PF: predicated region fallthrough
CT: control target
= control target key end

     0   :  { %6 = vsyncpa [#allocation3], 0  ;;  %s154_s0 = inlined_call_operand.hbm [shape: f32[16,128], index: 0, kind: input, shape index: {}]   ;;  %s155_s1 = inlined_call_operand.hbm [shape: f32[8,128], index: 1, kind: output, shape index: {}]  }
   0x1   :  { %7 = vsyncpa [#allocation4], 0  ;;  %s116_s6 = smov [#allocation2]   ;;  %s68_s10 = scalar_lea.hbm %s154_s0, 256 }
   0x2   :  { %s17_s7 = sshll.u32 %s116_s6, 4  ;;  %p69_p0 = scmp.ne.s32.totalorder %s154_s0, %s68_s10  ;;  %s18_s7 = int_to_ptr.vmem [resolvable:$true] %s17_s7 }
   0x3   :  { %p72_p1 = scmp.lt.u32.totalorder %s68_s10, %s154_s0 }
   0x5   :  { %p74_p2 = pnand %p72_p1, %p69_p0 }
   0x7   :  { %77 = shalt.err (!%p74_p2)
}
   0x8   :  { %s78_s15 = scalar_lea.vmem %s18_s7, 256  ;;  %p83_p4 = scmp.lt.s32.totalorder %s18_s7, %s18_s7 }
   0x9   :  { %p79_p3 = scmp.ne.s32.totalorder %s18_s7, %s78_s15  ;;  %p84_p5 = scmp.lt.s32.totalorder %s78_s15, %s78_s15 }
   0xb   :  { %p85_p6 = por %p84_p5, %p83_p4 }
   0xd   :  { %p86_p7 = pnand %p85_p6, %p79_p3 }
   0xf   :  { %89 = shalt.err (!%p86_p7)
}
  0x10   :  { %s117_s16 = smov 128   ;;  %s118_s17 = smov 8  }
  0x11   :  { %23 = dma.hbm_to_vmem [thread:$0]  %s154_s0, 256, %s18_s7, [#allocation3], %s117_s16, %s117_s16, %s118_s17  }
  0x12   :  { %112 = dma.done.wait [#allocation3], 256  }
  0x13   :  { %113 = vsyncadd [#allocation3], 4294967040  ;;  %v34_v0 = vld [vmem:[#allocation2] sm:$0xff]  ;;  %v35_v1 = vld [vmem:[#allocation2 + $0x8] sm:$0xff]  ;;  %s119_s20 = smov [#allocation5]  }
  0x14   :  { %64 = vlog2.f32 %v34_v0  ;;  %s50_s21 = sshll.u32 %s119_s20, 4  ;;  %s51_s21 = int_to_ptr.vmem [resolvable:$true] %s50_s21 }
  0x15   :  { %66 = vlog2.f32 %v35_v1  ;;  %s90_s22 = scalar_lea.vmem %s51_s21, 128  ;;  %p95_p9 = scmp.lt.s32.totalorder %s51_s21, %s51_s21 }
  0x16   :  { %p91_p8 = scmp.ne.s32.totalorder %s51_s21, %s90_s22  ;;  %p96_p10 = scmp.lt.s32.totalorder %s90_s22, %s90_s22 }
  0x18   :  { %p97_p11 = por %p96_p10, %p95_p9 }
  0x1a   :  { %p98_p12 = pnand %p97_p11, %p91_p8 }
  0x1e   :  { %v65_v2 = vpop.eup %64 }
  0x1f   :  { %v67_v3 = vpop.eup %66  ;;  %v38_v4 = vmul.f32 0.6931472, %v65_v2 }
  0x20   :  { %v40_v5 = vmul.f32 0.6931472, %v67_v3 }
  0x22   :  { %v41_v6 = vadd.f32 %v40_v5, %v38_v4 }
  0x24   :  { %43 = vst [vmem:[#allocation5] sm:$0xff] %v41_v6 }
  0x25   :  { %101 = shalt.err (!%p98_p12)
}
  0x26   :  { %s102_s24 = scalar_lea.hbm %s155_s1, 128 }
  0x27   :  { %p103_p13 = scmp.ne.s32.totalorder %s155_s1, %s102_s24  ;;  %p106_p0 = scmp.lt.u32.totalorder %s102_s24, %s155_s1 }
  0x29   :  { %p108_p1 = pnand %p106_p0, %p103_p13 }
  0x2b   :  { %111 = shalt.err (!%p108_p1)
}
  0x2c   :  { %53 = dma.vmem_to_hbm [thread:$0]  %s51_s21, 128, %s155_s1, [#allocation4]  }
  0x2d   :  { %114 = dma.done.wait [#allocation4], 128  }
  0x2e   :  { %115 = vsyncadd [#allocation4], 4294967168 }
  0x2f   :  { %57 = vsyncpa [#allocation3], 1 }
  0x30   :  { %58 = vsyncpa [#allocation4], 1 }

</bundles_post_ra>
